<compile_context>
chip_gen: v7x
topology: tpu7x:2x2x1
jax: 0.10.0
libtpu: 0.0.40
codegen_flags: <defaults>
</compile_context>

<pallas_src>
import functools

import jax
import jax.numpy as jnp
from jax import lax
from jax.experimental import pallas as pl
from jax.experimental.pallas import tpu as pltpu


def _round_up(v, m):
    return (v + m - 1) // m * m


# ---------------------------------------------------------------------------
# Pass 1: dilated conv as a tap-tiled MXU contraction + fused BN partial stats
# ---------------------------------------------------------------------------
def _conv_stats_kernel(w_ref, x_ref, y_ref, stats_ref, acc_ref):
    # w_ref: (Cout_p, Cin_p) bf16 for the current tap; x_ref: (Cin_p, m_tile) bf16.
    t = pl.program_id(1)

    @pl.when(t == 0)
    def _():
        acc_ref[...] = jnp.zeros_like(acc_ref)

    acc_ref[...] += jnp.dot(w_ref[...], x_ref[...],
                            preferred_element_type=jnp.float32)

    @pl.when(t == pl.num_programs(1) - 1)
    def _():
        acc = acc_ref[...]
        y_ref[...] = acc.astype(y_ref.dtype)
        # Per-channel partial statistics for this M-tile (zero-padded columns contribute 0,
        # so the wrapper just divides by the real M).  Only the two reduced lanes are written.
        stats_ref[:, 0:1] = jnp.sum(acc, axis=1, keepdims=True)
        stats_ref[:, 1:2] = jnp.sum(acc * acc, axis=1, keepdims=True)


# ---------------------------------------------------------------------------
# Pass 2: scale * y + shift, then ReLU (scale/shift pre-folded per channel)
# ---------------------------------------------------------------------------
def _bn_relu_kernel(scale_ref, shift_ref, y_ref, o_ref):
    y = y_ref[...].astype(jnp.float32)
    o_ref[...] = jnp.maximum(y * scale_ref[...] + shift_ref[...], 0.0).astype(o_ref.dtype)


@functools.partial(jax.jit, static_argnames=("padding", "dilation", "eps", "m_tile"))
def aspp_forward(x, weight, gamma, beta, *, padding, dilation, eps=1e-5, m_tile=1024):
    """x: (N, Cin, H, W) NCHW; weight: (Cout, Cin, K, K) OIHW (PyTorch layout)."""
    N, Cin, H, W = x.shape
    Cout, _, KH, KW = weight.shape
    Hout = H + 2 * padding - dilation * (KH - 1)
    Wout = W + 2 * padding - dilation * (KW - 1)
    T = KH * KW
    M = N * Hout * Wout

    # Per-tap contraction dim: lane-aligned when Cin is large, minimal padding when tiny.
    Cin_p = _round_up(Cin, 128) if Cin >= 128 else _round_up(Cin, 8)
    Cout_p = _round_up(Cout, 8)

    m_tile = _round_up(min(m_tile, _round_up(M, 128)), 128)
    MT = -(-M // m_tile)
    if MT > 1:
        MT = _round_up(MT, 2)      # balanced shards for the two v7x TensorCores
    M_p = MT * m_tile

    # ---- glue: im2col into a lane-dense (T, Cin_p, M_p) bf16 tap stack ----
    xp = jnp.pad(x, ((0, 0), (0, 0), (padding, padding), (padding, padding)))
    taps = []
    for kh in range(KH):
        for kw in range(KW):
            taps.append(xp[:, :, kh * dilation:kh * dilation + Hout,
                              kw * dilation:kw * dilation + Wout])
    x_col = jnp.stack(taps, axis=0)                             # (T, N, Cin, Hout, Wout)
    x_col = x_col.transpose(0, 2, 1, 3, 4).reshape(T, Cin, M)   # rows cin, cols (n, ho, wo)
    x_col = jnp.pad(x_col, ((0, 0), (0, Cin_p - Cin), (0, M_p - M))).astype(jnp.bfloat16)

    w_col = weight.transpose(2, 3, 0, 1).reshape(T, Cout, Cin)  # tap-major, matches x_col taps
    w_col = jnp.pad(w_col, ((0, 0), (0, Cout_p - Cout), (0, Cin_p - Cin))).astype(jnp.bfloat16)

    # ---- pass 1: conv (tap-accumulated MXU contraction) + fused per-tile BN partial sums ----
    vmem1 = (2 * Cin_p * m_tile * 2        # x tap blocks (double-buffered, bf16)
             + 2 * Cout_p * Cin_p * 2      # per-tap weight blocks (bf16)
             + 2 * Cout_p * m_tile * 2     # y output blocks (bf16)
             + 2 * Cout_p * 8 * 4          # stats blocks
             + Cout_p * m_tile * 4)        # f32 accumulator scratch
    cparams1 = pltpu.CompilerParams(
        dimension_semantics=("parallel", "arbitrary"),
        vmem_limit_bytes=int(min(100 * 2**20, max(2 * vmem1, 8 * 2**20))),
    )

    y_pad, stats = pl.pallas_call(
        _conv_stats_kernel,
        grid=(MT, T),
        in_specs=[
            pl.BlockSpec((None, Cout_p, Cin_p), lambda j, t: (t, 0, 0)),
            pl.BlockSpec((None, Cin_p, m_tile), lambda j, t: (t, 0, j)),
        ],
        out_specs=[
            pl.BlockSpec((Cout_p, m_tile), lambda j, t: (0, j)),
            pl.BlockSpec((None, Cout_p, 8), lambda j, t: (j, 0, 0)),
        ],
        out_shape=[
            jax.ShapeDtypeStruct((Cout_p, M_p), jnp.bfloat16),
            jax.ShapeDtypeStruct((MT, Cout_p, 8), jnp.float32),
        ],
        scratch_shapes=[pltpu.VMEM((Cout_p, m_tile), jnp.float32)],
        compiler_params=cparams1,
    )(w_col, x_col)

    # ---- per-channel BN folding (O(Cout) work, done once, f32) ----
    sums = jnp.sum(stats[:, :, 0], axis=0)                      # (Cout_p,)
    sumsq = jnp.sum(stats[:, :, 1], axis=0)
    mean = sums / M
    var = jnp.maximum(sumsq / M - mean * mean, 0.0)              # biased var (training-mode BN)
    gamma_p = jnp.pad(gamma.astype(jnp.float32), (0, Cout_p - Cout))
    beta_p = jnp.pad(beta.astype(jnp.float32), (0, Cout_p - Cout))
    scale = gamma_p * lax.rsqrt(var + eps)
    shift = beta_p - mean * scale

    # ---- pass 2: apply BN scale/shift + ReLU over the bf16 conv output ----
    out_dtype = x.dtype
    vmem2 = (2 * Cout_p * m_tile * 2       # y input blocks (bf16)
             + 2 * Cout_p * m_tile * jnp.dtype(out_dtype).itemsize
             + 4 * Cout_p * 4)             # scale/shift
    cparams2 = pltpu.CompilerParams(
        dimension_semantics=("parallel",),
        vmem_limit_bytes=int(min(100 * 2**20, max(2 * vmem2, 8 * 2**20))),
    )

    out_pad = pl.pallas_call(
        _bn_relu_kernel,
        grid=(MT,),
        in_specs=[
            pl.BlockSpec((Cout_p, 1), lambda j: (0, 0)),
            pl.BlockSpec((Cout_p, 1), lambda j: (0, 0)),
            pl.BlockSpec((Cout_p, m_tile), lambda j: (0, j)),
        ],
        out_specs=pl.BlockSpec((Cout_p, m_tile), lambda j: (0, j)),
        out_shape=jax.ShapeDtypeStruct((Cout_p, M_p), out_dtype),
        compiler_params=cparams2,
    )(scale.reshape(Cout_p, 1), shift.reshape(Cout_p, 1), y_pad)

    out = out_pad[:Cout, :M].reshape(Cout, N, Hout, Wout)
    return jnp.transpose(out, (1, 0, 2, 3))                     # back to NCHW


def ref_forward(x, weight, gamma, beta, *, padding, dilation, eps=1e-5):
    """Pure-JAX f32 reference of the PyTorch forward (training-mode BN)."""
    y = lax.conv_general_dilated(
        x, weight, window_strides=(1, 1),
        padding=((padding, padding), (padding, padding)),
        rhs_dilation=(dilation, dilation),
        dimension_numbers=("NCHW", "OIHW", "NCHW"))
    mean = jnp.mean(y, axis=(0, 2, 3), keepdims=True)
    var = jnp.mean(jnp.square(y - mean), axis=(0, 2, 3), keepdims=True)
    y = (y - mean) * lax.rsqrt(var + eps)
    y = y * gamma.reshape(1, -1, 1, 1) + beta.reshape(1, -1, 1, 1)
    return jnp.maximum(y, 0.0)


if __name__ == "__main__":
    # Small ASPP-branch config: inplanes=4, planes=8, kernel_size=3,
    # padding=dilation=2 (typical atrous branch -> spatial size preserved).
    N, Cin, H, W = 2, 4, 16, 16
    Cout, K, padding, dilation = 8, 3, 2, 2

    key = jax.random.PRNGKey(0)
    kx, kw = jax.random.split(key)
    x = jax.random.normal(kx, (N, Cin, H, W), dtype=jnp.float32)

    # init_weight(): kaiming_normal_ (fan_in, gain=sqrt(2)); BN weight=1, bias=0.
    fan_in = Cin * K * K
    std = (2.0 / fan_in) ** 0.5
    weight = std * jax.random.normal(kw, (Cout, Cin, K, K), dtype=jnp.float32)
    gamma = jnp.ones((Cout,), dtype=jnp.float32)
    beta = jnp.zeros((Cout,), dtype=jnp.float32)

    # m_tile=256 so the small test exercises the multi-tile (M-tiled) code path.
    out = jax.block_until_ready(
        aspp_forward(x, weight, gamma, beta, padding=padding, dilation=dilation, m_tile=256))
    ref = jax.block_until_ready(
        ref_forward(x, weight, gamma, beta, padding=padding, dilation=dilation))

    assert out.shape == (N, Cout, H, W), out.shape
    # bf16 matmul inputs + bf16 conv-output staging -> loosened tolerance vs the f32 reference.
    assert jnp.allclose(out, ref, rtol=5e-2, atol=5e-2), float(jnp.max(jnp.abs(out - ref)))
    print("KERNEL_OK")
</pallas_src>

<mosaic_0001>
module attributes {stable_mosaic.version = 11 : i64} {
  func.func @_conv_stats_kernel(%arg0: i32, %arg1: i32, %arg2: memref<1x8x8xbf16, #tpu.memory_space<vmem>>, %arg3: memref<1x8x256xbf16, #tpu.memory_space<vmem>>, %arg4: memref<8x256xbf16, #tpu.memory_space<vmem>>, %arg5: memref<1x8x8xf32, #tpu.memory_space<vmem>>, %arg6: memref<8x256xf32, #tpu.memory_space<vmem>>) attributes {dimension_semantics = [#tpu.dimension_semantics<parallel>, #tpu.dimension_semantics<arbitrary>], iteration_bounds = array<i64: 2, 9>, scalar_prefetch = 0 : i64, scratch_operands = 1 : i64, tpu.core_type = #tpu.core_type<tc>, window_params = [{transform_indices = @transform_0, window_bounds = array<i64: 1, 8, 8>}, {transform_indices = @transform_1, window_bounds = array<i64: 1, 8, 256>}, {transform_indices = @transform_2, window_bounds = array<i64: 8, 256>}, {transform_indices = @transform_3, window_bounds = array<i64: 1, 8, 8>}]} {
    %c0_i32 = arith.constant 0 : i32
    %0 = arith.cmpi eq, %arg1, %c0_i32 : i32
    %1 = arith.extui %0 : i1 to i32
    %c0_i32_0 = arith.constant 0 : i32
    %2 = arith.cmpi ne, %1, %c0_i32_0 : i32
    scf.if %2 {
      %cst_11 = arith.constant 0.000000e+00 : f32
      %14 = vector.broadcast %cst_11 : f32 to vector<8x256xf32>
      %c0_12 = arith.constant 0 : index
      %c0_13 = arith.constant 0 : index
      %15 = vector.load %arg6[%c0_12, %c0_13] : memref<8x256xf32, #tpu.memory_space<vmem>>, vector<8x256xf32>
      tpu.vector_store %arg6[%c0_12, %c0_13], %14 {strides = array<i32>} : memref<8x256xf32, #tpu.memory_space<vmem>>, vector<8x256xf32>,
    } else {
    }
    %c0 = arith.constant 0 : index
    %c0_1 = arith.constant 0 : index
    %3 = vector.load %arg6[%c0, %c0_1] : memref<8x256xf32, #tpu.memory_space<vmem>>, vector<8x256xf32>
    %c0_2 = arith.constant 0 : index
    %c0_3 = arith.constant 0 : index
    %c0_4 = arith.constant 0 : index
    %4 = vector.load %arg2[%c0_2, %c0_3, %c0_4] : memref<1x8x8xbf16, #tpu.memory_space<vmem>>, vector<1x8x8xbf16>
    %5 = vector.shape_cast %4 : vector<1x8x8xbf16> to vector<8x8xbf16>
    %c0_5 = arith.constant 0 : index
    %c0_6 = arith.constant 0 : index
    %c0_7 = arith.constant 0 : index
    %6 = vector.load %arg3[%c0_5, %c0_6, %c0_7] : memref<1x8x256xbf16, #tpu.memory_space<vmem>>, vector<1x8x256xbf16>
    %7 = vector.shape_cast %6 : vector<1x8x256xbf16> to vector<8x256xbf16>
    %cst = arith.constant dense<0.000000e+00> : vector<8x256xf32>
    %8 = tpu.matmul %5, %7, %cst {dimension_numbers = #tpu.dot_dimension_numbers<[1], [0], [0], [1], [0, 0, 1, 1], [], []>} : vector<8x8xbf16>, vector<8x256xbf16>, vector<8x256xf32> -> vector<8x256xf32>
    %9 = arith.addf %3, %8 : vector<8x256xf32>
    %c0_8 = arith.constant 0 : index
    %c0_9 = arith.constant 0 : index
    %10 = vector.load %arg6[%c0_8, %c0_9] : memref<8x256xf32, #tpu.memory_space<vmem>>, vector<8x256xf32>
    tpu.vector_store %arg6[%c0_8, %c0_9], %9 {strides = array<i32>} : memref<8x256xf32, #tpu.memory_space<vmem>>, vector<8x256xf32>,
    %c8_i32 = arith.constant 8 : i32
    %11 = arith.cmpi eq, %arg1, %c8_i32 : i32
    %12 = arith.extui %11 : i1 to i32
    %c0_i32_10 = arith.constant 0 : i32
    %13 = arith.cmpi ne, %12, %c0_i32_10 : i32
    scf.if %13 {
      %c0_11 = arith.constant 0 : index
      %c0_12 = arith.constant 0 : index
      %14 = vector.load %arg6[%c0_11, %c0_12] : memref<8x256xf32, #tpu.memory_space<vmem>>, vector<8x256xf32>
      %15 = arith.truncf %14 : vector<8x256xf32> to vector<8x256xbf16>
      %c0_13 = arith.constant 0 : index
      %c0_14 = arith.constant 0 : index
      %16 = vector.load %arg4[%c0_13, %c0_14] : memref<8x256xbf16, #tpu.memory_space<vmem>>, vector<8x256xbf16>
      tpu.vector_store %arg4[%c0_13, %c0_14], %15 {strides = array<i32>} : memref<8x256xbf16, #tpu.memory_space<vmem>>, vector<8x256xbf16>,
      %cst_15 = arith.constant dense<0.000000e+00> : vector<8xf32>
      %17 = vector.multi_reduction <add>, %14, %cst_15 [1] : vector<8x256xf32> to vector<8xf32>
      %18 = vector.shape_cast %17 : vector<8xf32> to vector<8x1xf32>
      %c0_16 = arith.constant 0 : index
      %c0_17 = arith.constant 0 : index
      %c0_18 = arith.constant 0 : index
      %19 = vector.load %arg5[%c0_16, %c0_17, %c0_18] : memref<1x8x8xf32, #tpu.memory_space<vmem>>, vector<1x8x1xf32>
      %20 = vector.shape_cast %19 : vector<1x8x1xf32> to vector<8x1xf32>
      %21 = vector.shape_cast %18 : vector<8x1xf32> to vector<1x8x1xf32>
      tpu.vector_store %arg5[%c0_16, %c0_17, %c0_18], %21 {strides = array<i32>} : memref<1x8x8xf32, #tpu.memory_space<vmem>>, vector<1x8x1xf32>,
      %22 = arith.mulf %14, %14 : vector<8x256xf32>
      %cst_19 = arith.constant dense<0.000000e+00> : vector<8xf32>
      %23 = vector.multi_reduction <add>, %22, %cst_19 [1] : vector<8x256xf32> to vector<8xf32>
      %24 = vector.shape_cast %23 : vector<8xf32> to vector<8x1xf32>
      %c0_20 = arith.constant 0 : index
      %c0_21 = arith.constant 0 : index
      %c1 = arith.constant 1 : index
      %25 = vector.load %arg5[%c0_20, %c0_21, %c1] : memref<1x8x8xf32, #tpu.memory_space<vmem>>, vector<1x8x1xf32>
      %26 = vector.shape_cast %25 : vector<1x8x1xf32> to vector<8x1xf32>
      %27 = vector.shape_cast %24 : vector<8x1xf32> to vector<1x8x1xf32>
      tpu.vector_store %arg5[%c0_20, %c0_21, %c1], %27 {strides = array<i32>} : memref<1x8x8xf32, #tpu.memory_space<vmem>>, vector<1x8x1xf32>,
    } else {
    }
    return
  }
  func.func @transform_0(%arg0: i32, %arg1: i32) -> (i32, i32, i32) {
    %c0_i32 = arith.constant 0 : i32
    %c0_i32_0 = arith.constant 0 : i32
    %c0_i32_1 = arith.constant 0 : i32
    return %arg1, %c0_i32, %c0_i32_0 : i32, i32, i32
  }
  func.func @transform_1(%arg0: i32, %arg1: i32) -> (i32, i32, i32) {
    %c0_i32 = arith.constant 0 : i32
    %c0_i32_0 = arith.constant 0 : i32
    return %arg1, %c0_i32, %arg0 : i32, i32, i32
  }
  func.func @transform_2(%arg0: i32, %arg1: i32) -> (i32, i32) {
    %c0_i32 = arith.constant 0 : i32
    %c0_i32_0 = arith.constant 0 : i32
    return %c0_i32, %arg0 : i32, i32
  }
  func.func @transform_3(%arg0: i32, %arg1: i32) -> (i32, i32, i32) {
    %c0_i32 = arith.constant 0 : i32
    %c0_i32_0 = arith.constant 0 : i32
    %c0_i32_1 = arith.constant 0 : i32
    return %arg0, %c0_i32, %c0_i32_0 : i32, i32, i32
  }
}

module attributes {stable_mosaic.version = 11 : i64} {
  func.func @_bn_relu_kernel(%arg0: i32, %arg1: memref<8x1xf32, #tpu.memory_space<vmem>>, %arg2: memref<8x1xf32, #tpu.memory_space<vmem>>, %arg3: memref<8x256xbf16, #tpu.memory_space<vmem>>, %arg4: memref<8x256xf32, #tpu.memory_space<vmem>>) attributes {dimension_semantics = [#tpu.dimension_semantics<parallel>], iteration_bounds = array<i64: 2>, scalar_prefetch = 0 : i64, scratch_operands = 0 : i64, tpu.core_type = #tpu.core_type<tc>, window_params = [{pipeline_mode = #tpu.pipeline_mode<synchronous>, transform_indices = @transform_0, window_bounds = array<i64: 8, 1>}, {pipeline_mode = #tpu.pipeline_mode<synchronous>, transform_indices = @transform_1, window_bounds = array<i64: 8, 1>}, {transform_indices = @transform_2, window_bounds = array<i64: 8, 256>}, {transform_indices = @transform_3, window_bounds = array<i64: 8, 256>}]} {
    %c0 = arith.constant 0 : index
    %c0_0 = arith.constant 0 : index
    %0 = vector.load %arg3[%c0, %c0_0] : memref<8x256xbf16, #tpu.memory_space<vmem>>, vector<8x256xbf16>
    %1 = arith.extf %0 : vector<8x256xbf16> to vector<8x256xf32>
    %c0_1 = arith.constant 0 : index
    %c0_2 = arith.constant 0 : index
    %2 = vector.load %arg1[%c0_1, %c0_2] : memref<8x1xf32, #tpu.memory_space<vmem>>, vector<8x1xf32>
    %3 = vector.broadcast %2 : vector<8x1xf32> to vector<8x256xf32>
    %4 = arith.mulf %1, %3 : vector<8x256xf32>
    %c0_3 = arith.constant 0 : index
    %c0_4 = arith.constant 0 : index
    %5 = vector.load %arg2[%c0_3, %c0_4] : memref<8x1xf32, #tpu.memory_space<vmem>>, vector<8x1xf32>
    %6 = vector.broadcast %5 : vector<8x1xf32> to vector<8x256xf32>
    %7 = arith.addf %4, %6 : vector<8x256xf32>
    %cst = arith.constant 0.000000e+00 : f32
    %8 = vector.broadcast %cst : f32 to vector<8x256xf32>
    %9 = arith.maximumf %7, %8 : vector<8x256xf32>
    %c0_5 = arith.constant 0 : index
    %c0_6 = arith.constant 0 : index
    %10 = vector.load %arg4[%c0_5, %c0_6] : memref<8x256xf32, #tpu.memory_space<vmem>>, vector<8x256xf32>
    tpu.vector_store %arg4[%c0_5, %c0_6], %9 {strides = array<i32>} : memref<8x256xf32, #tpu.memory_space<vmem>>, vector<8x256xf32>,
    return
  }
  func.func @transform_0(%arg0: i32) -> (i32, i32) {
    %c0_i32 = arith.constant 0 : i32
    %c0_i32_0 = arith.constant 0 : i32
    %c0_i32_1 = arith.constant 0 : i32
    return %c0_i32, %c0_i32_0 : i32, i32
  }
  func.func @transform_1(%arg0: i32) -> (i32, i32) {
    %c0_i32 = arith.constant 0 : i32
    %c0_i32_0 = arith.constant 0 : i32
    %c0_i32_1 = arith.constant 0 : i32
    return %c0_i32, %c0_i32_0 : i32, i32
  }
  func.func @transform_2(%arg0: i32) -> (i32, i32) {
    %c0_i32 = arith.constant 0 : i32
    %c0_i32_0 = arith.constant 0 : i32
    return %c0_i32, %arg0 : i32, i32
  }
  func.func @transform_3(%arg0: i32) -> (i32, i32) {
    %c0_i32 = arith.constant 0 : i32
    %c0_i32_0 = arith.constant 0 : i32
    return %c0_i32, %arg0 : i32, i32
  }
}

</mosaic_0001>

<bundles_post_ra>
// kernel: aspp_forward.3
= control target key start
LH: loop header
LB: loop body
LE: loop exit
PB: predicated region body
PF: predicated region fallthrough
CT: control target
= control target key end

     0   :  { %s303_s12 = smov 0   ;;  %s326_s0 = inlined_call_operand.vmem [shape: f32[8,1], index: 0, kind: input, shape index: {}]   ;;  %s327_s1 = inlined_call_operand.vmem [shape: f32[8,1], index: 1, kind: input, shape index: {}]   ;;  %s328_s2 = inlined_call_operand.vmem [shape: bf16[8,512], index: 2, kind: input, shape index: {}]   ;;  %s329_s3 = inlined_call_operand.vmem [shape: f32[8,512], index: 3, kind: output, shape index: {}]  }
   0x1 LB: > { %s253_s13 = sadd.s32 4294967295, %s280_s12   ;;  %p257_p0 = scmp.ge.s32.totalorder %s280_s12, 1  ;;  %s280_s12 = sphi %s303_s12, %s13_s12  }
   0x2   : > { %p138_p1 = scmp.lt.s32.totalorder %s280_s12, 3 }
   0x4   : > { %p139_p2 = pnand %p257_p0, %p138_p1 }
   0x5   : > { %v177_v0 = vld [vmem:[%s326_s0] sm:$0xff] (!%p139_p2)  ;;  %v282_v1 = vmov (!%p139_p2), 0   ;;  %s258_s18 = sshll.u32 (!%p139_p2), %s253_s13, 1 }
   0x6   : > { %142 = sbr.rel (%p139_p2) target bundleno = 144 (0x90), region = 32  ;;  %273 = vset.pattern.permute.xlu0 (!%p139_p2), %v282_v1  ;;  %v185_v2 = vld [vmem:[%s327_s1] sm:$0xff] (!%p139_p2)  ;;  %p163_p3 = scmp.lt.s32.totalorder (!%p139_p2), %s258_s18, 3 }
   0x7   : > { %180 = vperm.xlu0 (!%p139_p2), %273, %v177_v0  }
   0xb   : > { %188 = vperm.xlu0 (!%p139_p2), %273, %v185_v2  }
   0xd   : > { %s331_s18 = smov (!%p163_p3, %s258_s18), 3 }
   0xe   : > { %s259_s19 = sshll.u32 %s331_s18, 2  ;;  %s261_s23 = sshll.u32 %s331_s18, 3 }
   0xf   : > { %s166_s22 = scalar_lea.vmem %s328_s2, %s259_s19  ;;  %s172_s26 = scalar_lea.vmem %s329_s3, %s261_s23 }
  0x10   : > { %v174_v3 = vld [vmem:[%s166_s22] sm:$0xff] }
  0x11   : > { %v175_v4 = vunpack.c.l.bf16 %v174_v3  ;;  %v176_v5 = vunpack.c.h.bf16 %v174_v3 }
  0x86   : > { %v181_v6 = vpop.permute.xlu0 %180 }
  0x87   : > { %v183_v7 = vmul.f32 %v181_v6, %v175_v4  ;;  %v184_v8 = vmul.f32 %v181_v6, %v176_v5 }
  0x8a   : > { %v189_v9 = vpop.permute.xlu0 %188 }
  0x8b   : > { %v191_v10 = vadd.f32 %v189_v9, %v183_v7  ;;  %v192_v11 = vadd.f32 %v189_v9, %v184_v8 }
  0x8d   : > { %v193_v12 = vmax.f32 %v191_v10, 0.0  ;;  %v194_v13 = vmax.f32 %v192_v11, 0.0 }
  0x8f   : > { %195 = vst [vmem:[%s172_s26] sm:$0xff] %v193_v12  ;;  %196 = vst [vmem:[%s172_s26 + $0x8] sm:$0xff] %v194_v13 }
  0x90 PF: > { %s13_s12 = sadd.s32 1, %s280_s12  }
  0x91   : > { %p10_p4 = scmp.ge.s32.totalorder %s13_s12, 4  }
  0x93   :  { %12 = sbr.rel (!%p10_p4) target bundleno = 1 (0x1), region = 62 }

// kernel: aspp_forward.2
= control target key start
LH: loop header
LB: loop body
LE: loop exit
PB: predicated region body
PF: predicated region fallthrough
CT: control target
= control target key end

     0   :  { %s572_s12 = smov 0   ;;  %s574_s13 = smov 0   ;;  %s642_s0 = inlined_call_operand.vmem [shape: bf16[9,8,8], index: 0, kind: input, shape index: {}]   ;;  %s643_s1 = inlined_call_operand.vmem [shape: bf16[9,8,512], index: 1, kind: input, shape index: {}]   ;;  %s644_s2 = inlined_call_operand.vmem [shape: bf16[8,512], index: 2, kind: output, shape index: {0}]   ;;  %s645_s3 = inlined_call_operand.vmem [shape: f32[2,8,8], index: 3, kind: output, shape index: {1}]  }
   0x1   :  { %s576_s14 = smov 0   ;;  %s578_s15 = smov 0  }
   0x2   :  { %s580_s16 = smov 0  }
   0x3 LB: > { %s23_s17 = sadd.s32 1, %s540_s14  ;;  %s26_s18 = sadd.s32 1, %s544_s15  ;;  %s548_s16 = sphi %s580_s16, %s14_s16   ;;  %s544_s15 = sphi %s578_s15, %s649_s15   ;;  %s540_s14 = sphi %s576_s14, %s648_s14   ;;  %s536_s13 = sphi %s574_s13, %s647_s13   ;;  %s532_s12 = sphi %s572_s12, %s646_s12  }
   0x4   : > { %p24_p0 = scmp.ge.s32.totalorder %s23_s17, 9  ;;  %p448_p1 = scmp.ge.s32.totalorder %s548_s16, 1 }
   0x5   : > { %p168_p2 = scmp.lt.s32.totalorder %s548_s16, 19 }
   0x6   : > { %s651_s17 = smov (%p24_p0, %s23_s17), 0  ;;  %s653_s18 = smov (!%p24_p0, %s26_s18), %s544_s15 }
   0x7   : > { %p169_p3 = pnand %p448_p1, %p168_p2  ;;  %p28_p4 = scmp.ge.s32.totalorder %s653_s18, 2 }
   0x8   : > { %p204_p5 = scmp.lt.s32.totalorder (!%p169_p3), %s532_s12, 8  ;;  %s450_s19 = sshll.u32 (!%p169_p3), %s536_s13, 1 }
   0x9   : > { %s655_s18 = smov (%p28_p4, %s653_s18), 0  ;;  %172 = sbr.rel (%p169_p3) target bundleno = 408 (0x198), region = 28 }
   0xa   : > { %p211_p6 = scmp.lt.s32.totalorder (!%p169_p3), %s450_s19, 3  ;;  %p224_p7 = scmp.lt.s32.totalorder (!%p169_p3), %s536_s13, 1 }
   0xb   : > { %p456_p8 = scmp.ne.s32.totalorder (!%p169_p3), %s532_s12, 0 }
  0x10   : > { %s205_s20 = scalar_select %p204_p5, %s532_s12, 8 }
  0x11   : > { %s657_s19 = smov (!%p211_p6, %s450_s19), 3  ;;  %s659_s13 = smov (!%p224_p7, %s536_s13), 1 }
  0x12   : > { %s449_s21 = sshll.u32 %s205_s20, 2  ;;  %s454_s27 = sshll.u32 %s657_s19, 2  ;;  %v550_v0 = vmov (!%p456_p8), 0.0  }
  0x13   : > { %s207_s24 = scalar_lea.vmem %s642_s0, %s449_s21  ;;  %s214_s25 = sadd.s32 %s449_s21, %s657_s19  ;;  %233 = vst [vmem:[#allocation2] sm:$0xff] (!%p456_p8), %v550_v0  ;;  %234 = vst [vmem:[#allocation2 + $0x8] sm:$0xff] (!%p456_p8), %v550_v0 }
  0x14   : > { %s452_s26 = sshll.u32 %s214_s25, 2  ;;  %s615_s6 = scalar_lea.vmem %s644_s2, %s454_s27 }
  0x15   : > { %s216_s30 = scalar_lea.vmem %s643_s1, %s452_s26  ;;  %s455_s7 = sshll.u32 %s659_s13, 3 }
  0x16   : > { %s620_s10 = scalar_lea.vmem %s645_s3, %s455_s7  ;;  %232 = sbr.rel (%p456_p8) target bundleno = 29 (0x1d), region = 32 }
  0x1d PF: > { %v238_v1 = vld [vmem:[%s216_s30] sm:$0xff]  ;;  %vm248_vm0 = vcmask 1043456   ;;  %v551_v4 = vmov 0   ;;  %vm244_vm1 = vcmask 64512   ;;  %v236_v8 = vld [vmem:[#allocation2 + $0x8] sm:$0xff]  ;;  %p461_p9 = scmp.ne.s32.totalorder %s532_s12, 8 }
  0x1e   : > { %v458_v2 = vcombine.high %v238_v1, %v238_v1  ;;  %v457_v3 = vcombine.low %v238_v1, %v238_v1  ;;  %287 = vmatprep.mubr.bf16.mxu0 %v551_v4  ;;  %v237_v6 = vld [vmem:[%s207_s24] sm:$0xf]  ;;  %vm318_vm2 = vcmask (!%p461_p9), 7168   ;;  %vm325_vm3 = vcmask (!%p461_p9), 15368  }
  0x1f   : > { %v235_v7 = vld [vmem:[#allocation2] sm:$0xff] }
  0x20   : > { %459 = vmatprep.subr.msk.bf16.mxu0 %vm248_vm0, %v458_v2  ;;  %v250_v5 = vsel %vm248_vm0, %v457_v3, 0 }
  0x21   : > { %256 = vmatpush1.bf16.msra.mxu0 %v250_v5 }
  0x24   : > { %460 = vmatmul.mubr.msk.bf16.vlgmr.msra.gmra.mrb[0].mxu0 %vm244_vm1, %v237_v6 }
  0xf5   : > { %303 = sbr.rel (%p461_p9) target bundleno = 408 (0x198), region = 36 }
  0xf7   : > { %v289_v9 = vpop.f32.mrb[0].mxu0 }
  0xf8   : > { %v296_v10 = vadd.f32 %v289_v9, %v235_v7  ;;  %v291_v11 = vpop.f32.mrb[1].mxu0 }
  0xf9   : > { %v297_v12 = vadd.f32 %v291_v11, %v236_v8  ;;  %v293_v13 = vpop.f32.mrb[2].mxu0 }
  0xfa   : > { %298 = vst [vmem:[#allocation2] sm:$0xff] %v296_v10  ;;  %v294_v14 = vpop.f32.mrb[3].mxu0 }
  0xfb   : > { %299 = vst [vmem:[#allocation2 + $0x8] sm:$0xff] %v297_v12 }
 0x101   : > { %v304_v15 = vld [vmem:[#allocation2] sm:$0xff] }
 0x102   : > { %v305_v16 = vld [vmem:[#allocation2 + $0x8] sm:$0xff]  ;;  %v320_v19 = vmul.f32 %v304_v15, %v304_v15 }
 0x103   : > { %v315_v17 = vadd.f32 %v305_v16, %v304_v15  ;;  %v465_v18 = vpack.c.bf16 %v305_v16, %v304_v15  ;;  %v321_v20 = vmul.f32 %v305_v16, %v305_v16 }
 0x105   : > { %316 = vadd.xlane.f32.xlu0 %v315_v17  ;;  %314 = vst [vmem:[%s615_s6] sm:$0xff] %v465_v18  ;;  %v322_v21 = vadd.f32 %v321_v20, %v320_v19 }
 0x109   : > { %323 = vadd.xlane.f32.xlu0 %v322_v21 }
 0x192   : > { %v317_v22 = vpop.xlane.xlu0 %316 }
 0x193   : > { %319 = vst.msk [vmem:[%s620_s10] sm:$0xff] %vm318_vm2, %v317_v22 }
 0x196   : > { %v324_v23 = vpop.xlane.xlu0 %323 }
 0x197   : > { %326 = vst.msk [vmem:[%s620_s10] sm:$0xff] %vm325_vm3, %v324_v23 }
 0x198 PF: > { %s14_s16 = sadd.s32 1, %s548_s16   ;;  %s646_s12 = smov %s540_s14 }
 0x199   : > { %p11_p10 = scmp.ge.s32.totalorder %s14_s16, 20   ;;  %s647_s13 = smov %s544_s15 }
 0x19a   : > { %s648_s14 = smov %s651_s17  ;;  %s649_s15 = smov %s655_s18 }
 0x19b   :  { %13 = sbr.rel (!%p11_p10) target bundleno = 3 (0x3), region = 81 }

</bundles_post_ra>
